<compile_context>
chip_gen: v5e
topology: v5e:2x2
jax: 0.10.0
libtpu: 0.0.40
codegen_flags: <defaults>
</compile_context>

<pallas_src>
import jax
import jax.numpy as jnp
from jax import lax
from jax.experimental import pallas as pl
from jax.experimental.pallas import tpu as pltpu


def _round_up(x, m):
    return (x + m - 1) // m * m


def _round_down(x, m):
    return (x // m) * m


def _make_nll_kernel(B, tb, chunk, n_chunks, need_row_mask):
    """Per batch-tile kernel: partial_ref[0, :] = sum over the tile's valid rows of
    sum_c log_softmax(logits)[r, c] * y[r, c], broadcast across all 128 lanes."""

    def rows_contrib(x, yv, global_row_start):
        x = x.astype(jnp.float32)                                   # (rows, C)
        yv = yv.astype(jnp.float32)                                 # (rows, C)
        # numerically stable log-sum-exp along the class (lane) axis
        m = jnp.max(x, axis=-1, keepdims=True)                      # (rows, 1)
        # NOTE(v7x): if the single EUP ever saturates with bf16 inputs, exp may be
        # computed in bf16 here (values in (-inf, 0]); keep f32 until measured.
        lse = m + jnp.log(jnp.sum(jnp.exp(x - m), axis=-1, keepdims=True))
        # sum_c logp*y == sum_c x*y - lse * sum_c y  (no full-tile logp temporary)
        sxy = jnp.sum(x * yv, axis=-1, keepdims=True)               # (rows, 1)
        sy = jnp.sum(yv, axis=-1, keepdims=True)                    # (rows, 1)
        contrib = sxy - lse * sy                                    # (rows, 1)
        if need_row_mask:
            rid = global_row_start + lax.broadcasted_iota(jnp.int32, contrib.shape, 0)
            contrib = jnp.where(rid < B, contrib, 0.0)              # mask OOB tail rows
        return jnp.sum(contrib, keepdims=True)                      # (1, 1) f32

    def kernel(logits_ref, y_ref, partial_ref):
        tile_row0 = pl.program_id(0) * tb
        if n_chunks == 1:
            total = rows_contrib(logits_ref[...], y_ref[...], tile_row0)
        else:
            def body(c, acc):
                s = pl.multiple_of(c * chunk, chunk)
                return acc + rows_contrib(logits_ref[pl.ds(s, chunk), :],
                                          y_ref[pl.ds(s, chunk), :],
                                          tile_row0 + s)
            total = lax.fori_loop(0, n_chunks, body,
                                  jnp.zeros((1, 1), jnp.float32),
                                  unroll=(n_chunks <= 8))
        # lane-dense store of the per-tile partial (all 128 lanes hold the scalar)
        partial_ref[...] = jnp.broadcast_to(total, partial_ref.shape).astype(jnp.float32)

    return kernel


def vae_loss_forward(logits, y, KL, curr_beta):
    """Pallas implementation of VAELoss.forward.

    logits: (B, C) float array (f32 or bf16)
    y:      (B, C) float array (targets / multi-hot), f32 or bf16
    KL:     scalar
    curr_beta: scalar (the module's _curr_beta)

    This kernel is HBM-streaming bound: for best throughput feed bf16 logits and
    targets directly from the producer (do NOT cast here in the wrapper — that
    adds an extra HBM read+write pass).  Math is f32 in-kernel.
    """
    B, C = logits.shape
    assert y.shape == (B, C), "logits and y must have the same (B, C) shape"
    it_l = jnp.dtype(logits.dtype).itemsize
    it_y = jnp.dtype(y.dtype).itemsize
    C_pad = _round_up(C, 128)          # physical lane footprint of a full-extent block

    # --- generation-aware VMEM budget ------------------------------------------
    try:
        vmem_cap = int(pltpu.get_tpu_info().vmem_capacity_bytes)
    except Exception:                   # pragma: no cover - conservative fallback
        vmem_cap = 64 * 1024 * 1024
    # ~40 MiB scoped on v7x (64 MiB VMEM/TC), up to ~80 MiB on v5e/v6e (128 MiB).
    vmem_target = min(vmem_cap * 5 // 8, 80 * 1024 * 1024)

    MISC = 4 * 1024 * 1024
    TEMPS_PER_ROW = 6 * C_pad * 4      # ~6 full-width f32 temporaries per in-flight chunk

    # --- choose the row chunk (bounds f32 temps) and the batch tile (by bytes) --
    if B <= 512:
        # Single full-extent block in both dims: always layout-legal, no masking.
        tb = B
        chunk = B
        n_chunks = 1
        need_row_mask = False
    else:
        chunk = max(16, min(512, _round_down((8 * 1024 * 1024) // max(1, TEMPS_PER_ROW), 16)))
        temps_bytes = chunk * TEMPS_PER_ROW
        input_budget = max(1, vmem_target - temps_bytes - MISC)
        row_in_bytes = C_pad * (it_l + it_y)          # both inputs counted
        tb = input_budget // (2 * row_in_bytes)        # 2 pipeline buffers per input
        tb = min(tb, 16 * chunk, _round_down(B, chunk))
        tb = max(chunk, _round_down(tb, chunk))
        n_chunks = tb // chunk
        need_row_mask = (B % tb) != 0                  # partial last tile -> mask rows

    n_tiles = pl.cdiv(B, tb)

    # --- VMEM accounting / optional deeper pipelining ---------------------------
    in_block_bytes = tb * C_pad * (it_l + it_y)
    deep_pipeline = (in_block_bytes < (1 << 20)) and (n_tiles >= 3)
    n_buf = 3 if deep_pipeline else 2
    temps_bytes = chunk * TEMPS_PER_ROW
    required = n_buf * in_block_bytes + temps_bytes + MISC
    vmem_limit = int(min(max(required, 32 * 1024 * 1024),
                         max(vmem_cap - 8 * 1024 * 1024, 32 * 1024 * 1024)))

    spec_kwargs = {"pipeline_mode": pl.Buffered(3)} if deep_pipeline else {}

    kernel = _make_nll_kernel(B, tb, chunk, n_chunks, need_row_mask)

    partials = pl.pallas_call(
        kernel,
        out_shape=jax.ShapeDtypeStruct((1, n_tiles * 128), jnp.float32),
        grid_spec=pl.GridSpec(
            grid=(n_tiles,),
            in_specs=[
                pl.BlockSpec((tb, C), lambda i: (i, 0), **spec_kwargs),
                pl.BlockSpec((tb, C), lambda i: (i, 0), **spec_kwargs),
            ],
            out_specs=pl.BlockSpec((1, 128), lambda i: (0, i)),
        ),
        compiler_params=pltpu.CompilerParams(
            dimension_semantics=("parallel",),   # independent tiles -> v7x dual-TC
            vmem_limit_bytes=vmem_limit,
        ),
    )(logits, y)

    # tiny final reduction in plain JAX (each lane of a tile block holds the same value)
    per_tile = partials.reshape(n_tiles, 128)[:, 0]
    total = jnp.sum(per_tile)

    neg_ll = -total / jnp.float32(B)
    weighted_KL = jnp.float32(curr_beta) * jnp.float32(KL)
    loss = neg_ll + weighted_KL
    return loss, {"nll": neg_ll, "KL": weighted_KL}


class VAELoss:
    """JAX/Pallas port of the PyTorch VAELoss module (forward pass runs on TPU)."""

    def __init__(self, beta=None, beta_cap=0.5, beta_steps=2000, beta_patience=5):
        self.beta = beta
        self.beta_cap = beta_cap
        self.beta_steps = beta_steps
        self._curr_beta = 0.0 if beta is None else beta
        self.patience = beta_patience
        self._n_steps_wo_increase = 0
        self._best_score = -float("inf")

    def forward(self, logits, KL, y):
        return vae_loss_forward(logits, y, KL, self._curr_beta)

    __call__ = forward

    def beta_step(self, score):
        # Host-side training-loop state (scalar Python), not TPU kernel compute.
        if self.beta is not None:
            return self._curr_beta
        if self._n_steps_wo_increase > self.patience:
            return self._curr_beta
        if self._best_score > score:
            self._n_steps_wo_increase += 1
        else:
            self._best_score = score
            self._n_steps_wo_increase = 0
        self._curr_beta += self.beta_cap / self.beta_steps
        self._curr_beta = min(self.beta_cap, self._curr_beta)
        return self._curr_beta


def _reference(logits, y, KL, curr_beta):
    logp = jax.nn.log_softmax(logits.astype(jnp.float32), axis=1)
    neg_ll = -jnp.mean(jnp.sum(logp * y.astype(jnp.float32), axis=1))
    weighted_KL = jnp.float32(curr_beta) * jnp.float32(KL)
    return neg_ll + weighted_KL, neg_ll, weighted_KL


if __name__ == "__main__":
    key = jax.random.PRNGKey(0)
    k1, k2, k3, k4, k5, k6 = jax.random.split(key, 6)

    # --- Test 1: aligned small shapes, f32, through the module-style class ---
    B, C = 16, 128
    logits = jax.random.normal(k1, (B, C), dtype=jnp.float32)
    y = (jax.random.uniform(k2, (B, C)) > 0.8).astype(jnp.float32)
    KL = 0.37
    crit = VAELoss(beta=0.2)             # _curr_beta = 0.2
    loss, parts = crit.forward(logits, KL, y)
    loss = jax.block_until_ready(loss)
    ref_loss, ref_nll, ref_kl = _reference(logits, y, KL, 0.2)
    assert jnp.allclose(loss, ref_loss, rtol=1e-5, atol=1e-5)
    assert jnp.allclose(parts["nll"], ref_nll, rtol=1e-5, atol=1e-5)
    assert jnp.allclose(parts["KL"], ref_kl, rtol=1e-6, atol=1e-6)

    # --- Test 2: ragged B and C (no padding copies — full-extent blocks), f32 ---
    B2, C2 = 10, 96
    logits2 = jax.random.normal(k3, (B2, C2), dtype=jnp.float32)
    y2 = (jax.random.uniform(k4, (B2, C2)) > 0.7).astype(jnp.float32)
    loss2, parts2 = vae_loss_forward(logits2, y2, 0.11, 0.05)
    jax.block_until_ready(loss2)
    ref_loss2, ref_nll2, _ = _reference(logits2, y2, 0.11, 0.05)
    assert jnp.allclose(loss2, ref_loss2, rtol=1e-5, atol=1e-5)
    assert jnp.allclose(parts2["nll"], ref_nll2, rtol=1e-5, atol=1e-5)

    # --- Test 3: bf16 inputs streamed end-to-end (no wrapper cast), f32 math ---
    lb = logits.astype(jnp.bfloat16)
    yb = y.astype(jnp.bfloat16)
    loss3, _ = vae_loss_forward(lb, yb, KL, 0.2)
    jax.block_until_ready(loss3)
    ref_loss3, _, _ = _reference(lb.astype(jnp.float32), yb.astype(jnp.float32), KL, 0.2)
    assert jnp.allclose(loss3, ref_loss3, rtol=1e-5, atol=1e-5)

    # --- Test 4: larger ragged batch -> multi-tile grid + chunked rows + masked tail ---
    B4, C4 = 1333, 200
    logits4 = jax.random.normal(k5, (B4, C4), dtype=jnp.float32)
    y4 = (jax.random.uniform(k6, (B4, C4)) > 0.9).astype(jnp.float32)
    loss4, parts4 = vae_loss_forward(logits4, y4, 0.5, 0.3)
    jax.block_until_ready(loss4)
    ref_loss4, ref_nll4, _ = _reference(logits4, y4, 0.5, 0.3)
    assert jnp.allclose(loss4, ref_loss4, rtol=1e-4, atol=1e-4)
    assert jnp.allclose(parts4["nll"], ref_nll4, rtol=1e-4, atol=1e-4)

    print("KERNEL_OK")
</pallas_src>

<mosaic_0001>
module attributes {stable_mosaic.version = 11 : i64} {
  func.func @kernel(%arg0: i32, %arg1: memref<16x128xf32, #tpu.memory_space<vmem>>, %arg2: memref<16x128xf32, #tpu.memory_space<vmem>>, %arg3: memref<1x128xf32, #tpu.memory_space<vmem>>) attributes {dimension_semantics = [#tpu.dimension_semantics<parallel>], iteration_bounds = array<i64: 1>, scalar_prefetch = 0 : i64, scratch_operands = 0 : i64, tpu.core_type = #tpu.core_type<tc>, window_params = [{transform_indices = @transform_0, window_bounds = array<i64: 16, 128>}, {transform_indices = @transform_1, window_bounds = array<i64: 16, 128>}, {transform_indices = @transform_2, window_bounds = array<i64: 1, 128>}]} {
    %c0 = arith.constant 0 : index
    %c0_0 = arith.constant 0 : index
    %0 = vector.load %arg1[%c0, %c0_0] : memref<16x128xf32, #tpu.memory_space<vmem>>, vector<16x128xf32>
    %c0_1 = arith.constant 0 : index
    %c0_2 = arith.constant 0 : index
    %1 = vector.load %arg2[%c0_1, %c0_2] : memref<16x128xf32, #tpu.memory_space<vmem>>, vector<16x128xf32>
    %cst = arith.constant dense<0xFF800000> : vector<16xf32>
    %2 = vector.multi_reduction <maximumf>, %0, %cst [1] : vector<16x128xf32> to vector<16xf32>
    %3 = vector.shape_cast %2 : vector<16xf32> to vector<16x1xf32>
    %4 = vector.broadcast %3 : vector<16x1xf32> to vector<16x128xf32>
    %5 = arith.subf %0, %4 : vector<16x128xf32>
    %6 = math.exp %5 : vector<16x128xf32>
    %cst_3 = arith.constant dense<0.000000e+00> : vector<16xf32>
    %7 = vector.multi_reduction <add>, %6, %cst_3 [1] : vector<16x128xf32> to vector<16xf32>
    %8 = vector.shape_cast %7 : vector<16xf32> to vector<16x1xf32>
    %9 = math.log %8 : vector<16x1xf32>
    %10 = arith.addf %3, %9 : vector<16x1xf32>
    %11 = arith.mulf %0, %1 : vector<16x128xf32>
    %cst_4 = arith.constant dense<0.000000e+00> : vector<16xf32>
    %12 = vector.multi_reduction <add>, %11, %cst_4 [1] : vector<16x128xf32> to vector<16xf32>
    %13 = vector.shape_cast %12 : vector<16xf32> to vector<16x1xf32>
    %cst_5 = arith.constant dense<0.000000e+00> : vector<16xf32>
    %14 = vector.multi_reduction <add>, %1, %cst_5 [1] : vector<16x128xf32> to vector<16xf32>
    %15 = vector.shape_cast %14 : vector<16xf32> to vector<16x1xf32>
    %16 = arith.mulf %10, %15 : vector<16x1xf32>
    %17 = arith.subf %13, %16 : vector<16x1xf32>
    %18 = vector.shape_cast %17 : vector<16x1xf32> to vector<1x16x1xf32>
    %cst_6 = arith.constant dense<0.000000e+00> : vector<1xf32>
    %19 = vector.multi_reduction <add>, %18, %cst_6 [1, 2] : vector<1x16x1xf32> to vector<1xf32>
    %20 = vector.shape_cast %19 : vector<1xf32> to vector<1x1x1xf32>
    %21 = vector.extract %20[0, 0, 0] : f32 from vector<1x1x1xf32>
    %22 = vector.broadcast %21 : f32 to vector<1x1xf32>
    %23 = vector.shape_cast %22 : vector<1x1xf32> to vector<1x1xf32>
    %24 = vector.broadcast %23 : vector<1x1xf32> to vector<1x128xf32>
    %c0_7 = arith.constant 0 : index
    %c0_8 = arith.constant 0 : index
    %25 = vector.load %arg3[%c0_7, %c0_8] : memref<1x128xf32, #tpu.memory_space<vmem>>, vector<1x128xf32>
    tpu.vector_store %arg3[%c0_7, %c0_8], %24 {strides = array<i32>} : memref<1x128xf32, #tpu.memory_space<vmem>>, vector<1x128xf32>,
    return
  }
  func.func @transform_0(%arg0: i32) -> (i32, i32) {
    %c0_i32 = arith.constant 0 : i32
    %c0_i32_0 = arith.constant 0 : i32
    return %arg0, %c0_i32 : i32, i32
  }
  func.func @transform_1(%arg0: i32) -> (i32, i32) {
    %c0_i32 = arith.constant 0 : i32
    %c0_i32_0 = arith.constant 0 : i32
    return %arg0, %c0_i32 : i32, i32
  }
  func.func @transform_2(%arg0: i32) -> (i32, i32) {
    %c0_i32 = arith.constant 0 : i32
    %c0_i32_0 = arith.constant 0 : i32
    return %c0_i32, %arg0 : i32, i32
  }
}

</mosaic_0001>

<bundles_post_ra>
// kernel: tpu_custom_call.1
= control target key start
LH: loop header
LB: loop body
LE: loop exit
PB: predicated region body
PF: predicated region fallthrough
CT: control target
= control target key end

     0   :  { %7 = vsyncpa [#allocation3], 0  ;;  %s237_s0 = inlined_call_operand.hbm [shape: f32[16,128], index: 0, kind: input, shape index: {}]   ;;  %s238_s1 = inlined_call_operand.hbm [shape: f32[16,128], index: 1, kind: input, shape index: {}]   ;;  %s239_s2 = inlined_call_operand.hbm [shape: f32[1,128], index: 2, kind: output, shape index: {}]  }
   0x1   :  { %8 = vsyncpa [#allocation6], 0 }
   0x2   :  { %9 = vsyncpa [#allocation4], 0  ;;  %s14_s11 = sshll.u32 %s237_s0, 4  ;;  %s208_s12 = smov [#allocation2]   ;;  %s15_s11 = int_to_ptr.hbm [resolvable:$true] %s14_s11 }
   0x3   :  { %s16_s13 = sshll.u32 %s208_s12, 4  ;;  %s27_s16 = sshll.u32 %s238_s1, 4  ;;  %s17_s13 = int_to_ptr.vmem [resolvable:$true] %s16_s13  ;;  %s28_s16 = int_to_ptr.hbm [resolvable:$true] %s27_s16 }
   0x4   :  { %s209_s17 = smov 128   ;;  %s210_s18 = smov 8  }
   0x5   :  { %22 = dma.hbm_to_vmem [thread:$0]  %s15_s11, 256, %s17_s13, [#allocation3], %s209_s17, %s209_s17, %s210_s18  }
   0x6   :  { %s211_s19 = smov [#allocation5]  }
   0x7   :  { %s29_s20 = sshll.u32 %s211_s19, 4  ;;  %s30_s20 = int_to_ptr.vmem [resolvable:$true] %s29_s20 }
   0x8   :  { %35 = dma.hbm_to_vmem [thread:$0]  %s28_s16, 256, %s30_s20, [#allocation6], %s209_s17, %s209_s17, %s210_s18  }
   0x9   :  { %202 = dma.done.wait [#allocation3], 256  }
   0xa   :  { %203 = vsyncadd [#allocation3], 4294967040 }
   0xb   :  { %204 = dma.done.wait [#allocation6], 256  }
   0xc   :  { %205 = vsyncadd [#allocation6], 4294967040  ;;  %v44_v0 = vld [vmem:[#allocation2] sm:$0xff]  ;;  %v45_v1 = vld [vmem:[#allocation2 + $0x8] sm:$0xff]  ;;  %vm82_vm0 = vcmask 7168   ;;  %s212_s0 = smov [#allocation7]  }
   0xd   :  { %48 = vmax.xlane.f32.xlu0 %v44_v0  ;;  %v46_v2 = vld [vmem:[#allocation5] sm:$0xff]  ;;  %v47_v4 = vld [vmem:[#allocation5 + $0x8] sm:$0xff]  ;;  %s102_s1 = sshll.u32 %s212_s0, 4  ;;  %s104_s23 = sshll.u32 %s239_s2, 4  ;;  %s103_s1 = int_to_ptr.vmem [resolvable:$true] %s102_s1  ;;  %s105_s23 = int_to_ptr.hbm [resolvable:$true] %s104_s23 }
   0xe   :  { %74 = vadd.xlane.f32.xlu2 %v46_v2  ;;  %v68_v3 = vmul.f32 %v46_v2, %v44_v0  ;;  %v69_v13 = vmul.f32 %v47_v4, %v45_v1 }
  0x15   :  { %50 = vmax.xlane.f32.xlu0 %v45_v1 }
  0x16   :  { %76 = vadd.xlane.f32.xlu2 %v47_v4 }
  0x1d   :  { %70 = vadd.xlane.f32.xlu0 %v68_v3 }
  0x80   :  { %v49_v5 = vpop.xlane.xlu0 %48 }
  0x81   :  { %v52_v6 = vsub.f32 %v44_v0, %v49_v5  ;;  %v75_v16 = vpop.xlane.xlu2 %74 }
  0x83   :  { %v54_v7 = vmul.f32 1.442695, %v52_v6 }
  0x85   :  { %122 = vpow2.f32 %v54_v7 }
  0x88   :  { %v51_v8 = vpop.xlane.xlu0 %50 }
  0x89   :  { %v53_v9 = vsub.f32 %v45_v1, %v51_v8  ;;  %v77_v24 = vpop.xlane.xlu2 %76 }
  0x8b   :  { %v123_v10 = vpop.eup %122  ;;  %v56_v11 = vmul.f32 1.442695, %v53_v9 }
  0x8c   :  { %58 = vadd.xlane.f32.xlu1 %v123_v10 }
  0x8d   :  { %124 = vpow2.f32 %v56_v11 }
  0x90   :  { %v71_v23 = vpop.xlane.xlu0 %70 }
  0x93   :  { %v125_v12 = vpop.eup %124 }
  0x94   :  { %60 = vadd.xlane.f32.xlu1 %v125_v12 }
  0x9c   :  { %72 = vadd.xlane.f32.xlu1 %v69_v13 }
  0xff   :  { %v59_v14 = vpop.xlane.xlu1 %58 }
 0x100   :  { %126 = vlog2.f32 %v59_v14 }
 0x106   :  { %v127_v15 = vpop.eup %126 }
 0x107   :  { %v63_v17 = vmul.f32 0.6931472, %v127_v15  ;;  %v61_v18 = vpop.xlane.xlu1 %60 }
 0x108   :  { %128 = vlog2.f32 %v61_v18 }
 0x109   :  { %v66_v19 = vadd.f32 %v63_v17, %v49_v5 }
 0x10b   :  { %v78_v22 = vmul.f32 %v75_v16, %v66_v19 }
 0x10d   :  { %v80_v27 = vsub.f32 %v71_v23, %v78_v22 }
 0x10e   :  { %v129_v20 = vpop.eup %128 }
 0x10f   :  { %v65_v21 = vmul.f32 0.6931472, %v129_v20  ;;  %v73_v26 = vpop.xlane.xlu1 %72  ;;  %v83_v30 = vsel %vm82_vm0, %v80_v27, 0.0 }
 0x111   :  { %v67_v25 = vadd.f32 %v65_v21, %v51_v8 }
 0x113   :  { %v79_v28 = vmul.f32 %v77_v24, %v67_v25 }
 0x115   :  { %v81_v29 = vsub.f32 %v73_v26, %v79_v28 }
 0x117   :  { %v84_v31 = vsel %vm82_vm0, %v81_v29, 0.0 }
 0x118   :  { %v85_v32 = vadd.f32 %v84_v31, %v83_v30 }
 0x11a   :  { %86 = vadd.xlane.f32.xlu2 %v85_v32 }
 0x18d   :  { %v87_v33 = vpop.xlane.xlu2 %86 }
 0x18e   :  { %v88_v34 = vrot.slane %v87_v33, 4 }
 0x190   :  { %v89_v35 = vadd.f32 %v88_v34, %v87_v33 }
 0x192   :  { %v90_v36 = vrot.slane %v89_v35, 2 }
 0x194   :  { %v91_v37 = vadd.f32 %v90_v36, %v89_v35 }
 0x196   :  { %v92_v38 = vrot.slane %v91_v37, 1 }
 0x198   :  { %v93_v39 = vadd.f32 %v92_v38, %v91_v37 }
 0x19a   :  { %115 = vpush %v93_v39 }
 0x1cb   :  { %s116_s24 = spop %115 }
 0x1cc   :  { %v95_v40 = vstv %s116_s24 }
 0x1cd   :  { %96 = vst [vmem:[#allocation7] sm:$0x1] %v95_v40 }
 0x1ce   :  { %107 = dma.vmem_to_hbm [thread:$0]  %s103_s1, 16, %s105_s23, [#allocation4]  }
 0x1cf   :  { %206 = dma.done.wait [#allocation4], 16  }
 0x1d0   :  { %207 = vsyncadd [#allocation4], 4294967280 }
 0x1d1   :  { %112 = vsyncpa [#allocation3], 1 }
 0x1d2   :  { %113 = vsyncpa [#allocation6], 1 }
 0x1d3   :  { %114 = vsyncpa [#allocation4], 1 }

</bundles_post_ra>
